<compile_context>
chip_gen: v7x
topology: tpu7x:2x2x1
jax: 0.10.0
libtpu: 0.0.40
codegen_flags: <defaults>
</compile_context>

<pallas_src>
import functools

import jax
import jax.numpy as jnp
from jax.experimental import pallas as pl
from jax.experimental.pallas import tpu as pltpu


def _round_up(a, m):
    return ((a + m - 1) // m) * m


# ----------------------------- Phase 1: pooling ------------------------------
def _pool_kernel(x_ref, batch_ref, sum_ref, cnt_ref, *, n_nodes, tiles_per_core):
    c = pl.program_id(0)          # core-split axis ("parallel")
    k = pl.program_id(1)          # node-tile axis ("arbitrary" reduction)
    tile_n = x_ref.shape[0]
    g = sum_ref.shape[0]

    @pl.when(k == 0)
    def _():
        sum_ref[...] = jnp.zeros_like(sum_ref)
        cnt_ref[...] = jnp.zeros_like(cnt_ref)

    # Unclamped global node offset of this tile. The index_map clamps the DMA'd
    # block index, but the validity mask uses the unclamped position, so
    # clamped/duplicated/partial tiles contribute exactly nothing.
    start = (c * tiles_per_core + k) * tile_n

    seg = batch_ref[...]                                                # [1, TILE_N] int32
    lane_pos = jax.lax.broadcasted_iota(jnp.int32, (1, tile_n), 1) + start
    valid_lane = lane_pos < n_nodes                                     # [1, TILE_N]
    graph_iota = jax.lax.broadcasted_iota(jnp.int32, (g, tile_n), 0)    # [G_pad, TILE_N]
    one_hot = ((seg == graph_iota) & valid_lane).astype(jnp.float32)    # [G_pad, TILE_N]

    # Zero out-of-range rows of x (guards against garbage/NaN in a partial tile).
    sub_pos = jax.lax.broadcasted_iota(jnp.int32, (tile_n, 1), 0) + start
    x_m = jnp.where(sub_pos < n_nodes, x_ref[...], 0).astype(jnp.float32)

    # Pooling sum on the MXU; node counts via lane reduction (idle XLU slot).
    sum_ref[...] += jnp.dot(one_hot, x_m, preferred_element_type=jnp.float32)
    cnt_ref[...] += jnp.sum(one_hot, axis=-1, keepdims=True)  # exact for <2^24 nodes/graph


# -------------------- Phase 2: combine + mean + post_mp MLP ------------------
def _finalize_kernel(sum_ref, cnt_ref, w1_ref, b1_ref, w2_ref, b2_ref, pred_ref):
    sums = sum_ref[0]
    cnts = cnt_ref[0]
    for i in range(1, sum_ref.shape[0]):        # static core-split count (1 or 2)
        sums = sums + sum_ref[i]
        cnts = cnts + cnt_ref[i]
    emb = sums / jnp.maximum(cnts, 1.0)                                   # global_mean_pool
    h = jnp.dot(emb, w1_ref[...], preferred_element_type=jnp.float32) + b1_ref[...]
    h = jnp.maximum(h, 0.0)                                               # ReLU
    out = jnp.dot(h, w2_ref[...], preferred_element_type=jnp.float32) + b2_ref[...]
    pred_ref[...] = out.astype(pred_ref.dtype)


# --------------------------------- wrapper -----------------------------------
def gnn_graph_head(x, batch_ids, y, w1, b1, w2, b2, num_graphs, *,
                   tile_n=8192, num_core_splits=2):
    """Returns (pred, label) like GNNGraphHead.forward."""
    N, D = x.shape
    H = w1.shape[1]
    O = w2.shape[1]
    itemsize = jnp.dtype(x.dtype).itemsize

    G_pad = _round_up(max(num_graphs, 1), 8)
    H_pad = _round_up(H, 128)
    O_pad = _round_up(O, 128)

    # Node tile: as large as possible (overhead-dominated below ~0.5 MiB tiles),
    # capped so the double-buffered x tile stays <= ~20 MiB (v7x-safe).
    budget = 20 * 1024 * 1024
    max_tile = max(128, (budget // (2 * D * itemsize)) // 128 * 128)
    TILE_N = max(128, (min(tile_n, max_tile) // 128) * 128)
    if N <= TILE_N:
        TILE_N = N                      # single full-extent block (always layout-legal)
    num_blocks = pl.cdiv(N, TILE_N)

    C = num_core_splits if num_blocks >= 2 else 1   # second TC only helps multi-tile
    tpc = pl.cdiv(num_blocks, C)                    # node tiles per core

    batch_2d = batch_ids.reshape(1, N).astype(jnp.int32)   # lane-major ids, no pad

    # Zero-padded, lane-aligned MLP params (tiny, one-off; padded rows/cols inert).
    w1_p = jnp.zeros((D, H_pad), jnp.float32).at[:, :H].set(w1.astype(jnp.float32))
    b1_p = jnp.zeros((1, H_pad), jnp.float32).at[0, :H].set(b1.astype(jnp.float32))
    w2_p = jnp.zeros((H_pad, O_pad), jnp.float32).at[:H, :O].set(w2.astype(jnp.float32))
    b2_p = jnp.zeros((1, O_pad), jnp.float32).at[0, :O].set(b2.astype(jnp.float32))

    last = num_blocks - 1
    x_map = lambda c, k: (jnp.minimum(c * tpc + k, last), 0)
    b_map = lambda c, k: (0, jnp.minimum(c * tpc + k, last))

    vmem_need = (2 * TILE_N * D * itemsize      # x (double-buffered)
                 + TILE_N * D * 4               # masked f32 tile temp
                 + 2 * TILE_N * 4               # batch ids (double-buffered)
                 + G_pad * TILE_N * 4           # one-hot temp
                 + 4 * G_pad * (D + 1) * 4)     # resident output accumulators
    vmem_limit = int(min(48 * 1024 * 1024,
                         max(16 * 1024 * 1024, vmem_need + 4 * 1024 * 1024)))

    flops = 2 * C * tpc * G_pad * TILE_N * D
    bytes_accessed = N * D * itemsize + N * 4 + C * G_pad * (D + 1) * 4

    sums, cnts = pl.pallas_call(
        functools.partial(_pool_kernel, n_nodes=N, tiles_per_core=tpc),
        grid=(C, tpc),
        in_specs=[
            pl.BlockSpec((TILE_N, D), x_map),         # x streamed in native dtype/width
            pl.BlockSpec((1, TILE_N), b_map),         # batch ids, lane-major
        ],
        out_specs=(
            pl.BlockSpec((None, G_pad, D), lambda c, k: (c, 0, 0)),   # per-core sums
            pl.BlockSpec((None, G_pad, 1), lambda c, k: (c, 0, 0)),   # per-core counts
        ),
        out_shape=(
            jax.ShapeDtypeStruct((C, G_pad, D), jnp.float32),
            jax.ShapeDtypeStruct((C, G_pad, 1), jnp.float32),
        ),
        compiler_params=pltpu.CompilerParams(
            dimension_semantics=("parallel", "arbitrary"),
            vmem_limit_bytes=vmem_limit,
        ),
        cost_estimate=pl.CostEstimate(flops=flops, transcendentals=0,
                                      bytes_accessed=bytes_accessed),
    )(x, batch_2d)

    pred_pad = pl.pallas_call(
        _finalize_kernel,
        out_shape=jax.ShapeDtypeStruct((G_pad, O_pad), jnp.float32),
    )(sums, cnts, w1_p, b1_p, w2_p, b2_p)

    pred = pred_pad[:num_graphs, :O]
    label = y  # _apply_index: label passes through unchanged
    return pred, label


# -------------------------------- reference ----------------------------------
def reference(x, batch_ids, y, w1, b1, w2, b2, num_graphs):
    """Pure-JAX f32 reference for correctness checking."""
    seg_sum = jax.ops.segment_sum(x, batch_ids, num_segments=num_graphs)
    counts = jax.ops.segment_sum(jnp.ones((x.shape[0],), x.dtype), batch_ids,
                                 num_segments=num_graphs)
    emb = seg_sum / jnp.maximum(counts, 1.0)[:, None]
    h = jnp.maximum(emb @ w1 + b1, 0.0)
    return h @ w2 + b2, y


if __name__ == "__main__":
    def run_case(n_nodes, dim_in, dim_out, num_graphs, seed, **kw):
        key = jax.random.PRNGKey(seed)
        k_x, k_b, k_w1, k_b1, k_w2, k_b2, k_y = jax.random.split(key, 7)
        x = jax.random.normal(k_x, (n_nodes, dim_in), dtype=jnp.float32)
        batch_ids = jnp.sort(
            jax.random.randint(k_b, (n_nodes,), 0, num_graphs, dtype=jnp.int32))
        y = jax.random.normal(k_y, (num_graphs, dim_out), dtype=jnp.float32)
        w1 = jax.random.normal(k_w1, (dim_in, dim_in), dtype=jnp.float32) * 0.1
        b1 = jax.random.normal(k_b1, (dim_in,), dtype=jnp.float32) * 0.01
        w2 = jax.random.normal(k_w2, (dim_in, dim_out), dtype=jnp.float32) * 0.1
        b2 = jax.random.normal(k_b2, (dim_out,), dtype=jnp.float32) * 0.01

        pred, label = gnn_graph_head(x, batch_ids, y, w1, b1, w2, b2, num_graphs, **kw)
        jax.block_until_ready(pred)

        ref_pred, ref_label = reference(x, batch_ids, y, w1, b1, w2, b2, num_graphs)
        assert pred.shape == (num_graphs, dim_out)
        assert jnp.allclose(pred, ref_pred, atol=1e-2, rtol=1e-2), (
            float(jnp.max(jnp.abs(pred - ref_pred))))
        assert jnp.array_equal(label, ref_label)

    # Small case (single tile, single core-split).
    run_case(n_nodes=64, dim_in=32, dim_out=8, num_graphs=4, seed=0)
    # Multi-tile case: exercises partial last tile, clamped duplicate tile and
    # the 2-way "parallel" core split (5 node blocks of 256 across 2 splits).
    run_case(n_nodes=1100, dim_in=32, dim_out=8, num_graphs=5, seed=1, tile_n=256)

    print("KERNEL_OK")
</pallas_src>

<mosaic_0001>
module attributes {stable_mosaic.version = 11 : i64} {
  func.func @_pool_kernel(%arg0: i32, %arg1: i32, %arg2: memref<64x32xf32, #tpu.memory_space<vmem>>, %arg3: memref<1x64xi32, #tpu.memory_space<vmem>>, %arg4: memref<1x8x32xf32, #tpu.memory_space<vmem>>, %arg5: memref<1x8x1xf32, #tpu.memory_space<vmem>>) attributes {dimension_semantics = [#tpu.dimension_semantics<parallel>, #tpu.dimension_semantics<arbitrary>], iteration_bounds = array<i64: 1, 1>, scalar_prefetch = 0 : i64, scratch_operands = 0 : i64, tpu.core_type = #tpu.core_type<tc>, window_params = [{transform_indices = @transform_0, window_bounds = array<i64: 64, 32>}, {transform_indices = @transform_1, window_bounds = array<i64: 1, 64>}, {transform_indices = @transform_2, window_bounds = array<i64: 1, 8, 32>}, {transform_indices = @transform_3, window_bounds = array<i64: 1, 8, 1>}]} {
    %c0_i32 = arith.constant 0 : i32
    %0 = arith.cmpi eq, %arg1, %c0_i32 : i32
    %1 = arith.extui %0 : i1 to i32
    %c0_i32_0 = arith.constant 0 : i32
    %2 = arith.cmpi ne, %1, %c0_i32_0 : i32
    scf.if %2 {
      %cst_20 = arith.constant 0.000000e+00 : f32
      %45 = vector.broadcast %cst_20 : f32 to vector<8x32xf32>
      %c0_21 = arith.constant 0 : index
      %c0_22 = arith.constant 0 : index
      %c0_23 = arith.constant 0 : index
      %46 = vector.load %arg4[%c0_21, %c0_22, %c0_23] : memref<1x8x32xf32, #tpu.memory_space<vmem>>, vector<1x8x32xf32>
      %47 = vector.shape_cast %46 : vector<1x8x32xf32> to vector<8x32xf32>
      %48 = vector.shape_cast %45 : vector<8x32xf32> to vector<1x8x32xf32>
      tpu.vector_store %arg4[%c0_21, %c0_22, %c0_23], %48 {strides = array<i32>} : memref<1x8x32xf32, #tpu.memory_space<vmem>>, vector<1x8x32xf32>,
      %cst_24 = arith.constant 0.000000e+00 : f32
      %49 = vector.broadcast %cst_24 : f32 to vector<8x1xf32>
      %c0_25 = arith.constant 0 : index
      %c0_26 = arith.constant 0 : index
      %c0_27 = arith.constant 0 : index
      %50 = vector.load %arg5[%c0_25, %c0_26, %c0_27] : memref<1x8x1xf32, #tpu.memory_space<vmem>>, vector<1x8x1xf32>
      %51 = vector.shape_cast %50 : vector<1x8x1xf32> to vector<8x1xf32>
      %52 = vector.shape_cast %49 : vector<8x1xf32> to vector<1x8x1xf32>
      tpu.vector_store %arg5[%c0_25, %c0_26, %c0_27], %52 {strides = array<i32>} : memref<1x8x1xf32, #tpu.memory_space<vmem>>, vector<1x8x1xf32>,
    } else {
    }
    %c1_i32 = arith.constant 1 : i32
    %3 = arith.muli %arg0, %c1_i32 : i32
    %4 = arith.addi %3, %arg1 : i32
    %c64_i32 = arith.constant 64 : i32
    %5 = arith.muli %4, %c64_i32 : i32
    %c0 = arith.constant 0 : index
    %c0_1 = arith.constant 0 : index
    %6 = vector.load %arg3[%c0, %c0_1] : memref<1x64xi32, #tpu.memory_space<vmem>>, vector<1x64xi32>
    %7 = tpu.iota {dimensions = array<i32: 1>} : vector<1x64xi32>
    %8 = vector.broadcast %5 : i32 to vector<1x64xi32>
    %9 = arith.addi %7, %8 : vector<1x64xi32>
    %c64_i32_2 = arith.constant 64 : i32
    %10 = vector.broadcast %c64_i32_2 : i32 to vector<1x64xi32>
    %11 = arith.cmpi slt, %9, %10 : vector<1x64xi32>
    %12 = tpu.iota {dimensions = array<i32: 0>} : vector<8x64xi32>
    %13 = vector.broadcast %6 : vector<1x64xi32> to vector<8x64xi32>
    %14 = arith.cmpi eq, %13, %12 : vector<8x64xi32>
    %15 = vector.broadcast %11 : vector<1x64xi1> to vector<8x64xi1>
    %16 = arith.andi %14, %15 : vector<8x64xi1>
    %17 = arith.extui %16 : vector<8x64xi1> to vector<8x64xi32>
    %18 = arith.sitofp %17 : vector<8x64xi32> to vector<8x64xf32>
    %19 = tpu.iota {dimensions = array<i32: 0>} : vector<64x1xi32>
    %20 = vector.broadcast %5 : i32 to vector<64x1xi32>
    %21 = arith.addi %19, %20 : vector<64x1xi32>
    %c64_i32_3 = arith.constant 64 : i32
    %22 = vector.broadcast %c64_i32_3 : i32 to vector<64x1xi32>
    %23 = arith.cmpi slt, %21, %22 : vector<64x1xi32>
    %c0_4 = arith.constant 0 : index
    %c0_5 = arith.constant 0 : index
    %24 = vector.load %arg2[%c0_4, %c0_5] : memref<64x32xf32, #tpu.memory_space<vmem>>, vector<64x32xf32>
    %c0_i32_6 = arith.constant 0 : i32
    %25 = arith.sitofp %c0_i32_6 : i32 to f32
    %26 = vector.shape_cast %23 : vector<64x1xi1> to vector<64x1xi1>
    %27 = vector.broadcast %26 : vector<64x1xi1> to vector<64x32xi1>
    %28 = vector.broadcast %25 : f32 to vector<64x32xf32>
    %29 = arith.select %27, %24, %28 : vector<64x32xi1>, vector<64x32xf32>
    %c0_7 = arith.constant 0 : index
    %c0_8 = arith.constant 0 : index
    %c0_9 = arith.constant 0 : index
    %30 = vector.load %arg4[%c0_7, %c0_8, %c0_9] : memref<1x8x32xf32, #tpu.memory_space<vmem>>, vector<1x8x32xf32>
    %31 = vector.shape_cast %30 : vector<1x8x32xf32> to vector<8x32xf32>
    %cst = arith.constant dense<0.000000e+00> : vector<8x32xf32>
    %32 = tpu.matmul %18, %29, %cst {dimension_numbers = #tpu.dot_dimension_numbers<[1], [0], [0], [1], [0, 0, 1, 1], [], []>} : vector<8x64xf32>, vector<64x32xf32>, vector<8x32xf32> -> vector<8x32xf32>
    %33 = arith.addf %31, %32 : vector<8x32xf32>
    %c0_10 = arith.constant 0 : index
    %c0_11 = arith.constant 0 : index
    %c0_12 = arith.constant 0 : index
    %34 = vector.load %arg4[%c0_10, %c0_11, %c0_12] : memref<1x8x32xf32, #tpu.memory_space<vmem>>, vector<1x8x32xf32>
    %35 = vector.shape_cast %34 : vector<1x8x32xf32> to vector<8x32xf32>
    %36 = vector.shape_cast %33 : vector<8x32xf32> to vector<1x8x32xf32>
    tpu.vector_store %arg4[%c0_10, %c0_11, %c0_12], %36 {strides = array<i32>} : memref<1x8x32xf32, #tpu.memory_space<vmem>>, vector<1x8x32xf32>,
    %c0_13 = arith.constant 0 : index
    %c0_14 = arith.constant 0 : index
    %c0_15 = arith.constant 0 : index
    %37 = vector.load %arg5[%c0_13, %c0_14, %c0_15] : memref<1x8x1xf32, #tpu.memory_space<vmem>>, vector<1x8x1xf32>
    %38 = vector.shape_cast %37 : vector<1x8x1xf32> to vector<8x1xf32>
    %cst_16 = arith.constant dense<0.000000e+00> : vector<8xf32>
    %39 = vector.multi_reduction <add>, %18, %cst_16 [1] : vector<8x64xf32> to vector<8xf32>
    %40 = vector.shape_cast %39 : vector<8xf32> to vector<8x1xf32>
    %41 = arith.addf %38, %40 : vector<8x1xf32>
    %c0_17 = arith.constant 0 : index
    %c0_18 = arith.constant 0 : index
    %c0_19 = arith.constant 0 : index
    %42 = vector.load %arg5[%c0_17, %c0_18, %c0_19] : memref<1x8x1xf32, #tpu.memory_space<vmem>>, vector<1x8x1xf32>
    %43 = vector.shape_cast %42 : vector<1x8x1xf32> to vector<8x1xf32>
    %44 = vector.shape_cast %41 : vector<8x1xf32> to vector<1x8x1xf32>
    tpu.vector_store %arg5[%c0_17, %c0_18, %c0_19], %44 {strides = array<i32>} : memref<1x8x1xf32, #tpu.memory_space<vmem>>, vector<1x8x1xf32>,
    return
  }
  func.func @transform_0(%arg0: i32, %arg1: i32) -> (i32, i32) {
    %c1_i32 = arith.constant 1 : i32
    %0 = arith.muli %arg0, %c1_i32 : i32
    %1 = arith.addi %0, %arg1 : i32
    %c0_i32 = arith.constant 0 : i32
    %2 = arith.minsi %1, %c0_i32 : i32
    %c0_i32_0 = arith.constant 0 : i32
    %c0_i32_1 = arith.constant 0 : i32
    return %2, %c0_i32_0 : i32, i32
  }
  func.func @transform_1(%arg0: i32, %arg1: i32) -> (i32, i32) {
    %c1_i32 = arith.constant 1 : i32
    %0 = arith.muli %arg0, %c1_i32 : i32
    %1 = arith.addi %0, %arg1 : i32
    %c0_i32 = arith.constant 0 : i32
    %2 = arith.minsi %1, %c0_i32 : i32
    %c0_i32_0 = arith.constant 0 : i32
    %c0_i32_1 = arith.constant 0 : i32
    return %c0_i32_0, %2 : i32, i32
  }
  func.func @transform_2(%arg0: i32, %arg1: i32) -> (i32, i32, i32) {
    %c0_i32 = arith.constant 0 : i32
    %c0_i32_0 = arith.constant 0 : i32
    %c0_i32_1 = arith.constant 0 : i32
    return %arg0, %c0_i32, %c0_i32_0 : i32, i32, i32
  }
  func.func @transform_3(%arg0: i32, %arg1: i32) -> (i32, i32, i32) {
    %c0_i32 = arith.constant 0 : i32
    %c0_i32_0 = arith.constant 0 : i32
    %c0_i32_1 = arith.constant 0 : i32
    return %arg0, %c0_i32, %c0_i32_0 : i32, i32, i32
  }
}

</mosaic_0001>

<bundles_post_ra>
// kernel: tpu_custom_call.1
= control target key start
LH: loop header
LB: loop body
LE: loop exit
PB: predicated region body
PF: predicated region fallthrough
CT: control target
= control target key end

     0   :  { %vm74_vm0 = vcmask 261120   ;;  %v81_v3 = vlaneseq  ;;  %v336_v4 = vmov 0.0|0.0   ;;  %v337_v7 = vmov 0.0   ;;  %s412_s0 = inlined_call_operand.vmem [shape: f32[64,32], index: 0, kind: input, shape index: {}]   ;;  %s413_s1 = inlined_call_operand.vmem [shape: s32[1,64], index: 1, kind: input, shape index: {}]   ;;  %s414_s2 = inlined_call_operand.hbm [shape: f32[1,8,32], index: 2, kind: output, shape index: {0}]   ;;  %s415_s3 = inlined_call_operand.vmem [shape: f32[1,8,1], index: 3, kind: output, shape index: {1}]  }
   0x1   :  { %v121_v0 = vld [vmem:[%s412_s0] sm:$0xff]  ;;  %v122_v1 = vld [vmem:[%s412_s0 + $0x8] sm:$0xff]  ;;  %v123_v2 = vld [vmem:[%s412_s0 + $0x10] sm:$0xff]  ;;  %296 = vmatprep.subr.bf16.mxu0 %v336_v4  ;;  %75 = vst.msk [vmem:[#allocation2] sm:$0xff] %vm74_vm0, %v337_v7  ;;  %vm76_vm1 = vcmask 7168   ;;  %vm338_vm2 = vmmov 0  }
   0x2   :  { %v297_v5 = vpack.c.bf16 %v122_v1, %v121_v0  ;;  %v124_v6 = vld [vmem:[%s412_s0 + $0x18] sm:$0xff]  ;;  %77 = vst.msk [vmem:[%s415_s3] sm:$0xff] %vm76_vm1, %v337_v7  ;;  %293 = vmatprep.mubr.msk.f32.mxu0 %vm338_vm2, %v337_v7  ;;  %v265_v8 = vld [vmem:[%s413_s1] ss:$0 sm:$0xff]  ;;  %v82_v9 = vand.u32 127, %v81_v3  ;;  %v87_v10 = vshrl.u32 %v81_v3, 7 }
   0x3   :  { %v300_v11 = vpack.c.bf16 %v124_v6, %v123_v2 }
   0x4   :  { %298 = vmatpush3.bf16.msra.mxu0 %v297_v5 }
   0x5   :  { %9 = vsyncpa [#allocation3], 0  ;;  %299 = vmatprep.subr.bf16.mxu0 %v336_v4  ;;  %v125_v12 = vld [vmem:[%s412_s0 + $0x20] sm:$0xff]  ;;  %v126_v13 = vld [vmem:[%s412_s0 + $0x28] sm:$0xff]  ;;  %vm85_vm3 = vcmp.lt.s32.totalorder %v82_v9, 64  ;;  %vm92_vm4 = vcmp.eq.s32.totalorder %v265_v8, %v87_v10  ;;  %vm154_vm6 = vcmask 523264  }
   0x6   :  { %vm95_vm5 = vmand %vm92_vm4, %vm85_vm3  ;;  %v303_v15 = vpack.c.bf16 %v126_v13, %v125_v12  ;;  %v127_v17 = vld [vmem:[%s412_s0 + $0x30] sm:$0xff]  ;;  %v128_v18 = vld [vmem:[%s412_s0 + $0x38] sm:$0xff]  ;;  %s339_s8 = smov [#allocation2]  }
   0x7   :  { %v266_v14 = vsel %vm95_vm5, 1.0, %v337_v7  ;;  %v306_v19 = vpack.c.bf16 %v128_v18, %v127_v17  ;;  %s244_s0 = sshll.u32 %s339_s8, 4  ;;  %s245_s0 = int_to_ptr.vmem [resolvable:$true] %s244_s0 }
   0x8   :  { %301 = vmatpush3.bf16.msra.mxu0 %v300_v11  ;;  %v232_v16 = vsel %vm154_vm6, %v266_v14, 0.0  ;;  %v153_v23 = vld [vmem:[#allocation2] sm:$0xff]  ;;  %s312_s9 = scalar_lea.vmem %s245_s0, 128  ;;  %p317_p1 = scmp.lt.s32.totalorder %s245_s0, %s245_s0 }
   0x9   :  { %302 = vmatprep.subr.bf16.mxu0 %v336_v4  ;;  %233 = vadd.xlane.f32.xlu0 %v232_v16  ;;  %v231_v20 = vld [vmem:[%s415_s3] sm:$0xff]  ;;  %p313_p0 = scmp.ne.s32.totalorder %s245_s0, %s312_s9  ;;  %p318_p2 = scmp.lt.s32.totalorder %s312_s9, %s312_s9 }
   0xb   :  { %p319_p3 = por %p318_p2, %p317_p1 }
   0xc   :  { %304 = vmatpush3.bf16.msra.mxu0 %v303_v15 }
   0xd   :  { %305 = vmatprep.subr.bf16.mxu0 %v336_v4  ;;  %p320_p4 = pnand %p319_p3, %p313_p0 }
  0x10   :  { %307 = vmatpush3.bf16.msra.mxu0 %v306_v19 }
  0x13   :  { %294 = vmatmul.mubr.msk.f32.vlgmr.msra.gmra.mrb[0].mxu0 %vm154_vm6, %v266_v14 }
  0x96   :  { %v234_v21 = vpop.xlane.xlu0 %233 }
  0x97   :  { %v235_v22 = vadd.f32 %v234_v21, %v231_v20 }
  0x99   :  { %237 = vst.msk [vmem:[%s415_s3] sm:$0xff] %vm76_vm1, %v235_v22 }
  0xe6   :  { %v224_v24 = vpop.f32.mrb[0].mxu0 }
  0xe7   :  { %v228_v25 = vadd.f32 %v224_v24, %v153_v23  ;;  %v295_v26 = vpop.f32.mrb[1].mxu0 }
  0xe9   :  { %230 = vst.msk [vmem:[#allocation2] sm:$0xff] %vm74_vm0, %v228_v25 }
  0xea   :  { %323 = shalt.err (!%p320_p4)
}
  0xeb   :  { %s324_s3 = scalar_lea.hbm %s414_s2, 128 }
  0xec   :  { %p325_p5 = scmp.ne.s32.totalorder %s414_s2, %s324_s3  ;;  %p328_p6 = scmp.lt.u32.totalorder %s324_s3, %s414_s2 }
  0xee   :  { %p330_p7 = pnand %p328_p6, %p325_p5 }
  0xf0   :  { %333 = shalt.err (!%p330_p7)
}
  0xf1   :  { %247 = dma.vmem_to_hbm [thread:$0]  %s245_s0, 128, %s414_s2, [#allocation3]  }
  0xf2   :  { %334 = dma.done.wait [#allocation3], 128  }
  0xf3   :  { %335 = vsyncadd [#allocation3], 4294967168 }
  0xf4   :  { %255 = vsyncpa [#allocation3], 1 }

</bundles_post_ra>
